<compile_context>
chip_gen: v5e
topology: v5e:2x2
jax: 0.10.0
libtpu: 0.0.40
codegen_flags: <defaults>
</compile_context>

<pallas_src>
import functools

import jax
import jax.numpy as jnp
from jax.experimental import pallas as pl
from jax.experimental.pallas import tpu as pltpu


def _dws_kernel(x_ref, wdw_ref, bdw_ref, wpw_ref, bpw_ref, o_ref, xp_ref,
                *, ksize, pad, tile_h):
    # x_ref   : (1, Cin, H, W)      one batch element, NCHW (channels-leading)
    # wdw_ref : (Cin, k, k)         depthwise filter
    # bdw_ref : (Cin, 1, 1)         depthwise bias (pre-shaped for broadcast)
    # wpw_ref : (Cout, Cin)         pointwise 1x1 filter
    # bpw_ref : (Cout, 1)           pointwise bias (pre-shaped for broadcast)
    # o_ref   : (1, Cout, TH*W)     lane-dense flattened output row-tile
    # xp_ref  : (Cin, H+2p, W+2p)   VMEM scratch: zero-halo copy of the input
    cin = x_ref.shape[1]
    hh = x_ref.shape[2]
    ww = x_ref.shape[3]
    t = pl.program_id(1)

    # Build the zero-padded (halo) copy of this batch element once (t == 0).
    # Borders stay zero; the interior is overwritten for every new batch
    # element.  This replaces the wrapper-side HBM jnp.pad pass.
    @pl.when(t == 0)
    def _():
        xp_ref[...] = jnp.zeros_like(xp_ref)
        xp_ref[:, pad:pad + hh, pad:pad + ww] = x_ref[0]

    row0 = pl.multiple_of(t * tile_h, tile_h)

    # Depthwise k x k conv: k^2 shifted-window MACs on the VPU, accumulated in
    # f32 registers.  Windows are read directly from the VMEM scratch ref (no
    # extra full-tile f32 copy).  Per-tap weight is a tiny (Cin,1,1) broadcast.
    w_all = wdw_ref[...].astype(jnp.float32)                    # (Cin, k, k)
    acc = jnp.zeros((cin, tile_h, ww), jnp.float32)
    for i in range(ksize):
        rows = pl.ds(row0 + i, tile_h)
        for j in range(ksize):
            win = xp_ref[:, rows, j:j + ww]                     # (Cin, TH, W)
            acc = acc + win.astype(jnp.float32) * w_all[:, i:i + 1, j:j + 1]
    acc = acc + bdw_ref[...].astype(jnp.float32)                # hoisted bias

    # Pointwise 1x1 conv as (Cout, Cin) @ (Cin, TH*W): N = TH*W is a multiple
    # of 128 (lane-dense).  Operands keep the input dtype (bf16 stays bf16 on
    # v6e/v7x), accumulation stays f32 via preferred_element_type.
    acc_flat = acc.reshape(cin, tile_h * ww).astype(x_ref.dtype)
    out = jax.lax.dot_general(
        wpw_ref[...], acc_flat, (((1,), (0,)), ((), ())),
        preferred_element_type=jnp.float32)
    out = out + bpw_ref[...].astype(jnp.float32)                # (Cout, 1)

    # Lane-dense store: last dim TH*W (multiple of 128) -> unmasked vst.
    o_ref[0] = out.astype(o_ref.dtype)


def depthwise_separable_conv(x, wdw, bdw, wpw, bpw, *, kernel_size,
                             tile_h=None):
    """Fused depthwise-separable conv.

    x   : (B, Cin, H, W)   NCHW, consumed directly (no transpose / pad in HBM)
    wdw : (Cin, k, k)      depthwise weight (PyTorch (Cin,1,k,k) squeezed)
    bdw : (Cin,)           depthwise bias
    wpw : (Cout, Cin)      pointwise weight (PyTorch (Cout,Cin,1,1) squeezed)
    bpw : (Cout,)          pointwise bias
    """
    assert kernel_size % 2 == 1, "even kernels pad asymmetrically; use odd k"
    B, Cin, H, W = x.shape
    Cout = wpw.shape[0]
    k = kernel_size
    p = (k - 1) // 2
    assert wdw.shape == (Cin, k, k)
    assert wpw.shape == (Cout, Cin)

    # Row-tile height: smallest sublane-aligned tile whose flattened width is a
    # multiple of 128 (lane-dense output store, bounded VMEM per step, several
    # grid steps per core for pipelining).  Fall back to the full image.
    if tile_h is None:
        tile_h = H
        for cand in (8, 16, 32, 64):
            if H % cand == 0 and (cand * W) % 128 == 0:
                tile_h = cand
                break
    assert H % tile_h == 0
    n_row_tiles = H // tile_h

    kernel = functools.partial(_dws_kernel, ksize=k, pad=p, tile_h=tile_h)

    out_flat = pl.pallas_call(
        kernel,
        out_shape=jax.ShapeDtypeStruct((B, Cout, H * W), x.dtype),
        grid_spec=pltpu.PrefetchScalarGridSpec(
            num_scalar_prefetch=0,
            grid=(B, n_row_tiles),
            in_specs=[
                # Input block is constant across the row-tile axis, so it is
                # DMA'd once per batch element and stays VMEM-resident.
                pl.BlockSpec((1, Cin, H, W), lambda b, t: (b, 0, 0, 0)),
                # Weights/biases: constant block index -> fetched once.
                pl.BlockSpec((Cin, k, k), lambda b, t: (0, 0, 0)),
                pl.BlockSpec((Cin, 1, 1), lambda b, t: (0, 0, 0)),
                pl.BlockSpec((Cout, Cin), lambda b, t: (0, 0)),
                pl.BlockSpec((Cout, 1), lambda b, t: (0, 0)),
            ],
            out_specs=pl.BlockSpec((1, Cout, tile_h * W),
                                   lambda b, t: (b, 0, t)),
            scratch_shapes=[
                pltpu.VMEM((Cin, H + 2 * p, W + 2 * p), x.dtype),
            ],
        ),
        compiler_params=pltpu.CompilerParams(
            # Batch axis shards across TensorCores; the row-tile axis is kept
            # on one core ("arbitrary") because the halo scratch is filled at
            # t == 0 and reused for t > 0 of the same batch element.
            dimension_semantics=("parallel", "arbitrary"),
            vmem_limit_bytes=32 * 1024 * 1024,
        ),
    )(x, wdw, bdw.reshape(Cin, 1, 1), wpw, bpw.reshape(Cout, 1))

    # Contiguous reshape only (no data movement): (B,Cout,H*W) -> (B,Cout,H,W).
    return out_flat.reshape(B, Cout, H, W)


def _reference(x, wdw, bdw, wpw, bpw, kernel_size):
    """Pure-JAX reference (lax conv), NCHW like PyTorch."""
    Cin = x.shape[1]
    p = (kernel_size - 1) // 2
    w_dw = wdw[:, None, :, :]                      # (Cin, 1, k, k)
    y = jax.lax.conv_general_dilated(
        x, w_dw, window_strides=(1, 1), padding=[(p, p), (p, p)],
        dimension_numbers=("NCHW", "OIHW", "NCHW"),
        feature_group_count=Cin)
    y = y + bdw[None, :, None, None]
    w_pw = wpw[:, :, None, None]                   # (Cout, Cin, 1, 1)
    z = jax.lax.conv_general_dilated(
        y, w_pw, window_strides=(1, 1), padding=[(0, 0), (0, 0)],
        dimension_numbers=("NCHW", "OIHW", "NCHW"))
    return z + bpw[None, :, None, None]


if __name__ == "__main__":
    B, Cin, Cout, H, W, K = 2, 4, 8, 16, 16, 3

    key = jax.random.PRNGKey(0)
    kx, k1, k2, k3, k4 = jax.random.split(key, 5)
    x = jax.random.normal(kx, (B, Cin, H, W), dtype=jnp.float32)

    # Deterministic parameter init (shapes per nn.Conv2d in the module).
    wdw = jax.random.normal(k1, (Cin, K, K), dtype=jnp.float32) * 0.1
    bdw = jax.random.normal(k2, (Cin,), dtype=jnp.float32) * 0.1
    wpw = jax.random.normal(k3, (Cout, Cin), dtype=jnp.float32) * 0.1
    bpw = jax.random.normal(k4, (Cout,), dtype=jnp.float32) * 0.1

    out = depthwise_separable_conv(x, wdw, bdw, wpw, bpw, kernel_size=K)
    out = jax.block_until_ready(out)

    ref = _reference(x, wdw, bdw, wpw, bpw, K)
    assert out.shape == (B, Cout, H, W)
    assert jnp.allclose(out, ref, atol=1e-4, rtol=1e-4), "mismatch vs reference"

    print("KERNEL_OK")
</pallas_src>

<mosaic_0001>
module attributes {stable_mosaic.version = 11 : i64} {
  func.func @_dws_kernel(%arg0: i32, %arg1: i32, %arg2: memref<1x4x16x16xf32, #tpu.memory_space<vmem>>, %arg3: memref<4x3x3xf32, #tpu.memory_space<vmem>>, %arg4: memref<4x1x1xf32, #tpu.memory_space<vmem>>, %arg5: memref<8x4xf32, #tpu.memory_space<vmem>>, %arg6: memref<8x1xf32, #tpu.memory_space<vmem>>, %arg7: memref<1x8x128xf32, #tpu.memory_space<vmem>>, %arg8: memref<4x18x18xf32, #tpu.memory_space<vmem>>) attributes {dimension_semantics = [#tpu.dimension_semantics<parallel>, #tpu.dimension_semantics<arbitrary>], iteration_bounds = array<i64: 2, 2>, scalar_prefetch = 0 : i64, scratch_operands = 1 : i64, tpu.core_type = #tpu.core_type<tc>, window_params = [{transform_indices = @transform_0, window_bounds = array<i64: 1, 4, 16, 16>}, {pipeline_mode = #tpu.pipeline_mode<synchronous>, transform_indices = @transform_1, window_bounds = array<i64: 4, 3, 3>}, {pipeline_mode = #tpu.pipeline_mode<synchronous>, transform_indices = @transform_2, window_bounds = array<i64: 4, 1, 1>}, {pipeline_mode = #tpu.pipeline_mode<synchronous>, transform_indices = @transform_3, window_bounds = array<i64: 8, 4>}, {pipeline_mode = #tpu.pipeline_mode<synchronous>, transform_indices = @transform_4, window_bounds = array<i64: 8, 1>}, {transform_indices = @transform_5, window_bounds = array<i64: 1, 8, 128>}]} {
    %c0_i32 = arith.constant 0 : i32
    %0 = arith.cmpi eq, %arg1, %c0_i32 : i32
    %1 = arith.extui %0 : i1 to i32
    %c0_i32_0 = arith.constant 0 : i32
    %2 = arith.cmpi ne, %1, %c0_i32_0 : i32
    scf.if %2 {
      %cst_31 = arith.constant 0.000000e+00 : f32
      %76 = vector.broadcast %cst_31 : f32 to vector<4x18x18xf32>
      %c0_32 = arith.constant 0 : index
      %c0_33 = arith.constant 0 : index
      %c0_34 = arith.constant 0 : index
      %77 = vector.load %arg8[%c0_32, %c0_33, %c0_34] : memref<4x18x18xf32, #tpu.memory_space<vmem>>, vector<4x18x18xf32>
      tpu.vector_store %arg8[%c0_32, %c0_33, %c0_34], %76 {strides = array<i32>} : memref<4x18x18xf32, #tpu.memory_space<vmem>>, vector<4x18x18xf32>,
      %c0_35 = arith.constant 0 : index
      %c0_36 = arith.constant 0 : index
      %c0_37 = arith.constant 0 : index
      %c0_38 = arith.constant 0 : index
      %78 = vector.load %arg2[%c0_35, %c0_36, %c0_37, %c0_38] : memref<1x4x16x16xf32, #tpu.memory_space<vmem>>, vector<1x4x16x16xf32>
      %79 = vector.shape_cast %78 : vector<1x4x16x16xf32> to vector<4x16x16xf32>
      %c0_39 = arith.constant 0 : index
      %c1_40 = arith.constant 1 : index
      %c1_41 = arith.constant 1 : index
      %80 = vector.load %arg8[%c0_39, %c1_40, %c1_41] : memref<4x18x18xf32, #tpu.memory_space<vmem>>, vector<4x16x16xf32>
      tpu.vector_store %arg8[%c0_39, %c1_40, %c1_41], %79 {strides = array<i32>} : memref<4x18x18xf32, #tpu.memory_space<vmem>>, vector<4x16x16xf32>,
    } else {
    }
    %c8_i32 = arith.constant 8 : i32
    %3 = arith.muli %arg1, %c8_i32 : i32
    %4 = tpu.assume_multiple %3, 8 : i32
    %c0 = arith.constant 0 : index
    %c0_1 = arith.constant 0 : index
    %c0_2 = arith.constant 0 : index
    %5 = vector.load %arg3[%c0, %c0_1, %c0_2] : memref<4x3x3xf32, #tpu.memory_space<vmem>>, vector<4x3x3xf32>
    %cst = arith.constant 0.000000e+00 : f32
    %6 = vector.broadcast %cst : f32 to vector<4x8x16xf32>
    %c0_i32_3 = arith.constant 0 : i32
    %7 = arith.addi %4, %c0_i32_3 : i32
    %c0_4 = arith.constant 0 : index
    %8 = arith.index_cast %7 : i32 to index
    %c0_5 = arith.constant 0 : index
    %9 = vector.load %arg8[%c0_4, %8, %c0_5] : memref<4x18x18xf32, #tpu.memory_space<vmem>>, vector<4x8x16xf32>
    %10 = vector.extract_strided_slice %5 {offsets = [0, 0, 0], sizes = [4, 1, 1], strides = [1, 1, 1]} : vector<4x3x3xf32> to vector<4x1x1xf32>
    %11 = vector.broadcast %10 : vector<4x1x1xf32> to vector<4x8x16xf32>
    %12 = arith.mulf %9, %11 : vector<4x8x16xf32>
    %13 = arith.addf %6, %12 : vector<4x8x16xf32>
    %c0_6 = arith.constant 0 : index
    %14 = arith.index_cast %7 : i32 to index
    %c1 = arith.constant 1 : index
    %15 = vector.load %arg8[%c0_6, %14, %c1] : memref<4x18x18xf32, #tpu.memory_space<vmem>>, vector<4x8x16xf32>
    %16 = vector.extract_strided_slice %5 {offsets = [0, 0, 1], sizes = [4, 1, 1], strides = [1, 1, 1]} : vector<4x3x3xf32> to vector<4x1x1xf32>
    %17 = vector.broadcast %16 : vector<4x1x1xf32> to vector<4x8x16xf32>
    %18 = arith.mulf %15, %17 : vector<4x8x16xf32>
    %19 = arith.addf %13, %18 : vector<4x8x16xf32>
    %c0_7 = arith.constant 0 : index
    %20 = arith.index_cast %7 : i32 to index
    %c2 = arith.constant 2 : index
    %21 = vector.load %arg8[%c0_7, %20, %c2] : memref<4x18x18xf32, #tpu.memory_space<vmem>>, vector<4x8x16xf32>
    %22 = vector.extract_strided_slice %5 {offsets = [0, 0, 2], sizes = [4, 1, 1], strides = [1, 1, 1]} : vector<4x3x3xf32> to vector<4x1x1xf32>
    %23 = vector.broadcast %22 : vector<4x1x1xf32> to vector<4x8x16xf32>
    %24 = arith.mulf %21, %23 : vector<4x8x16xf32>
    %25 = arith.addf %19, %24 : vector<4x8x16xf32>
    %c1_i32 = arith.constant 1 : i32
    %26 = arith.addi %4, %c1_i32 : i32
    %c0_8 = arith.constant 0 : index
    %27 = arith.index_cast %26 : i32 to index
    %c0_9 = arith.constant 0 : index
    %28 = vector.load %arg8[%c0_8, %27, %c0_9] : memref<4x18x18xf32, #tpu.memory_space<vmem>>, vector<4x8x16xf32>
    %29 = vector.extract_strided_slice %5 {offsets = [0, 1, 0], sizes = [4, 1, 1], strides = [1, 1, 1]} : vector<4x3x3xf32> to vector<4x1x1xf32>
    %30 = vector.broadcast %29 : vector<4x1x1xf32> to vector<4x8x16xf32>
    %31 = arith.mulf %28, %30 : vector<4x8x16xf32>
    %32 = arith.addf %25, %31 : vector<4x8x16xf32>
    %c0_10 = arith.constant 0 : index
    %33 = arith.index_cast %26 : i32 to index
    %c1_11 = arith.constant 1 : index
    %34 = vector.load %arg8[%c0_10, %33, %c1_11] : memref<4x18x18xf32, #tpu.memory_space<vmem>>, vector<4x8x16xf32>
    %35 = vector.extract_strided_slice %5 {offsets = [0, 1, 1], sizes = [4, 1, 1], strides = [1, 1, 1]} : vector<4x3x3xf32> to vector<4x1x1xf32>
    %36 = vector.broadcast %35 : vector<4x1x1xf32> to vector<4x8x16xf32>
    %37 = arith.mulf %34, %36 : vector<4x8x16xf32>
    %38 = arith.addf %32, %37 : vector<4x8x16xf32>
    %c0_12 = arith.constant 0 : index
    %39 = arith.index_cast %26 : i32 to index
    %c2_13 = arith.constant 2 : index
    %40 = vector.load %arg8[%c0_12, %39, %c2_13] : memref<4x18x18xf32, #tpu.memory_space<vmem>>, vector<4x8x16xf32>
    %41 = vector.extract_strided_slice %5 {offsets = [0, 1, 2], sizes = [4, 1, 1], strides = [1, 1, 1]} : vector<4x3x3xf32> to vector<4x1x1xf32>
    %42 = vector.broadcast %41 : vector<4x1x1xf32> to vector<4x8x16xf32>
    %43 = arith.mulf %40, %42 : vector<4x8x16xf32>
    %44 = arith.addf %38, %43 : vector<4x8x16xf32>
    %c2_i32 = arith.constant 2 : i32
    %45 = arith.addi %4, %c2_i32 : i32
    %c0_14 = arith.constant 0 : index
    %46 = arith.index_cast %45 : i32 to index
    %c0_15 = arith.constant 0 : index
    %47 = vector.load %arg8[%c0_14, %46, %c0_15] : memref<4x18x18xf32, #tpu.memory_space<vmem>>, vector<4x8x16xf32>
    %48 = vector.extract_strided_slice %5 {offsets = [0, 2, 0], sizes = [4, 1, 1], strides = [1, 1, 1]} : vector<4x3x3xf32> to vector<4x1x1xf32>
    %49 = vector.broadcast %48 : vector<4x1x1xf32> to vector<4x8x16xf32>
    %50 = arith.mulf %47, %49 : vector<4x8x16xf32>
    %51 = arith.addf %44, %50 : vector<4x8x16xf32>
    %c0_16 = arith.constant 0 : index
    %52 = arith.index_cast %45 : i32 to index
    %c1_17 = arith.constant 1 : index
    %53 = vector.load %arg8[%c0_16, %52, %c1_17] : memref<4x18x18xf32, #tpu.memory_space<vmem>>, vector<4x8x16xf32>
    %54 = vector.extract_strided_slice %5 {offsets = [0, 2, 1], sizes = [4, 1, 1], strides = [1, 1, 1]} : vector<4x3x3xf32> to vector<4x1x1xf32>
    %55 = vector.broadcast %54 : vector<4x1x1xf32> to vector<4x8x16xf32>
    %56 = arith.mulf %53, %55 : vector<4x8x16xf32>
    %57 = arith.addf %51, %56 : vector<4x8x16xf32>
    %c0_18 = arith.constant 0 : index
    %58 = arith.index_cast %45 : i32 to index
    %c2_19 = arith.constant 2 : index
    %59 = vector.load %arg8[%c0_18, %58, %c2_19] : memref<4x18x18xf32, #tpu.memory_space<vmem>>, vector<4x8x16xf32>
    %60 = vector.extract_strided_slice %5 {offsets = [0, 2, 2], sizes = [4, 1, 1], strides = [1, 1, 1]} : vector<4x3x3xf32> to vector<4x1x1xf32>
    %61 = vector.broadcast %60 : vector<4x1x1xf32> to vector<4x8x16xf32>
    %62 = arith.mulf %59, %61 : vector<4x8x16xf32>
    %63 = arith.addf %57, %62 : vector<4x8x16xf32>
    %c0_20 = arith.constant 0 : index
    %c0_21 = arith.constant 0 : index
    %c0_22 = arith.constant 0 : index
    %64 = vector.load %arg4[%c0_20, %c0_21, %c0_22] : memref<4x1x1xf32, #tpu.memory_space<vmem>>, vector<4x1x1xf32>
    %65 = vector.broadcast %64 : vector<4x1x1xf32> to vector<4x8x16xf32>
    %66 = arith.addf %63, %65 : vector<4x8x16xf32>
    %67 = vector.shape_cast %66 : vector<4x8x16xf32> to vector<4x128xf32>
    %c0_23 = arith.constant 0 : index
    %c0_24 = arith.constant 0 : index
    %68 = vector.load %arg5[%c0_23, %c0_24] : memref<8x4xf32, #tpu.memory_space<vmem>>, vector<8x4xf32>
    %cst_25 = arith.constant dense<0.000000e+00> : vector<8x128xf32>
    %69 = tpu.matmul %68, %67, %cst_25 {dimension_numbers = #tpu.dot_dimension_numbers<[1], [0], [0], [1], [0, 0, 1, 1], [], []>} : vector<8x4xf32>, vector<4x128xf32>, vector<8x128xf32> -> vector<8x128xf32>
    %c0_26 = arith.constant 0 : index
    %c0_27 = arith.constant 0 : index
    %70 = vector.load %arg6[%c0_26, %c0_27] : memref<8x1xf32, #tpu.memory_space<vmem>>, vector<8x1xf32>
    %71 = vector.broadcast %70 : vector<8x1xf32> to vector<8x128xf32>
    %72 = arith.addf %69, %71 : vector<8x128xf32>
    %c0_28 = arith.constant 0 : index
    %c0_29 = arith.constant 0 : index
    %c0_30 = arith.constant 0 : index
    %73 = vector.load %arg7[%c0_28, %c0_29, %c0_30] : memref<1x8x128xf32, #tpu.memory_space<vmem>>, vector<1x8x128xf32>
    %74 = vector.shape_cast %73 : vector<1x8x128xf32> to vector<8x128xf32>
    %75 = vector.shape_cast %72 : vector<8x128xf32> to vector<1x8x128xf32>
    tpu.vector_store %arg7[%c0_28, %c0_29, %c0_30], %75 {strides = array<i32>} : memref<1x8x128xf32, #tpu.memory_space<vmem>>, vector<1x8x128xf32>,
    return
  }
  func.func @transform_0(%arg0: i32, %arg1: i32) -> (i32, i32, i32, i32) {
    %c0_i32 = arith.constant 0 : i32
    %c0_i32_0 = arith.constant 0 : i32
    %c0_i32_1 = arith.constant 0 : i32
    %c0_i32_2 = arith.constant 0 : i32
    return %arg0, %c0_i32, %c0_i32_0, %c0_i32_1 : i32, i32, i32, i32
  }
  func.func @transform_1(%arg0: i32, %arg1: i32) -> (i32, i32, i32) {
    %c0_i32 = arith.constant 0 : i32
    %c0_i32_0 = arith.constant 0 : i32
    %c0_i32_1 = arith.constant 0 : i32
    %c0_i32_2 = arith.constant 0 : i32
    return %c0_i32, %c0_i32_0, %c0_i32_1 : i32, i32, i32
  }
  func.func @transform_2(%arg0: i32, %arg1: i32) -> (i32, i32, i32) {
    %c0_i32 = arith.constant 0 : i32
    %c0_i32_0 = arith.constant 0 : i32
    %c0_i32_1 = arith.constant 0 : i32
    %c0_i32_2 = arith.constant 0 : i32
    return %c0_i32, %c0_i32_0, %c0_i32_1 : i32, i32, i32
  }
  func.func @transform_3(%arg0: i32, %arg1: i32) -> (i32, i32) {
    %c0_i32 = arith.constant 0 : i32
    %c0_i32_0 = arith.constant 0 : i32
    %c0_i32_1 = arith.constant 0 : i32
    return %c0_i32, %c0_i32_0 : i32, i32
  }
  func.func @transform_4(%arg0: i32, %arg1: i32) -> (i32, i32) {
    %c0_i32 = arith.constant 0 : i32
    %c0_i32_0 = arith.constant 0 : i32
    %c0_i32_1 = arith.constant 0 : i32
    return %c0_i32, %c0_i32_0 : i32, i32
  }
  func.func @transform_5(%arg0: i32, %arg1: i32) -> (i32, i32, i32) {
    %c0_i32 = arith.constant 0 : i32
    %c0_i32_0 = arith.constant 0 : i32
    return %arg0, %c0_i32, %arg1 : i32, i32, i32
  }
}

</mosaic_0001>

<bundles_post_ra>
// kernel: tpu_custom_call.1
= control target key start
LH: loop header
LB: loop body
LE: loop exit
PB: predicated region body
PF: predicated region fallthrough
CT: control target
= control target key end

     0   :  { %10 = vsyncpa [#allocation4], 0  ;;  %s1772_s0 = inlined_call_operand.hbm [shape: f32[2,4,16,16], index: 0, kind: input, shape index: {}]   ;;  %s1773_s1 = inlined_call_operand.vmem [shape: f32[4,3,3], index: 1, kind: input, shape index: {}]   ;;  %s1774_s2 = inlined_call_operand.vmem [shape: f32[4,1,1], index: 2, kind: input, shape index: {}]   ;;  %s1775_s3 = inlined_call_operand.vmem [shape: f32[8,4], index: 3, kind: input, shape index: {}]   ;;  %s1776_s4 = inlined_call_operand.vmem [shape: f32[8,1], index: 4, kind: input, shape index: {}]   ;;  %s1777_s5 = inlined_call_operand.hbm [shape: f32[2,8,256], index: 5, kind: output, shape index: {}]  }
   0x1   :  { %12 = vsyncpa [#allocation4 + $0x1], 0 }
   0x2   :  { %13 = vsyncpa [#allocation5], 0 }
   0x3   :  { %15 = vsyncpa [#allocation5 + $0x1], 0  ;;  %s1387_s18 = smov 0   ;;  %s1389_s19 = smov 0  }
   0x4   :  { %s1391_s20 = smov 0   ;;  %s1393_s21 = smov 0  }
   0x5   :  { %s1395_s22 = smov 0   ;;  %s1397_s23 = smov 0  }
   0x6   :  { %s1399_s24 = smov 0   ;;  %s1401_s25 = smov 0  }
   0x7   :  { %s1403_s26 = smov 0   ;;  %s1405_s27 = smov 0  }
   0x8   :  { %s1407_s28 = smov 0  }
   0x9 LB: > { %1783 = sst [smem:[#allocation9_spill]] %s1331_s26  ;;  %s960_s29 = sadd.s32 4294967295, %s1339_s28   ;;  %s1339_s28 = sphi %s1407_s28, %s21_s28   ;;  %s1335_s27 = sphi %s1405_s27, %s1801_s27   ;;  %s1331_s26 = sphi %s1403_s26, %s1800_s26   ;;  %s1327_s25 = sphi %s1401_s25, %s1799_s25   ;;  %s1323_s24 = sphi %s1399_s24, %s1798_s24   ;;  %s1319_s23 = sphi %s1397_s23, %s1807_s23   ;;  %s1315_s22 = sphi %s1395_s22, %s1806_s22   ;;  %s1311_s21 = sphi %s1393_s21, %s1805_s21   ;;  %s1307_s20 = sphi %s1391_s20, %s1804_s20   ;;  %s1303_s19 = sphi %s1389_s19, %s1803_s19   ;;  %s1299_s18 = sphi %s1387_s18, %s1802_s18  }
   0xa   : > { %1784 = sst [smem:[#allocation10_spill]] %s1335_s27  ;;  %s961_s30 = sadd.s32 4294967294, %s1339_s28  }
   0xb   : > { %s30_s6 = sadd.s32 1, %s1331_s26  ;;  %s33_s7 = sadd.s32 1, %s1335_s27 }
   0xc   : > { %p31_p0 = scmp.ge.s32.totalorder %s30_s6, 2  ;;  %s40_s8 = sadd.s32 1, %s1319_s23 }
   0xd   : > { %p47_p1 = scmp.ne.s32.totalorder %s1319_s23, %s1315_s22  ;;  %p48_p2 = scmp.eq.s32.totalorder %s1339_s28, 0 }
   0xe   : > { %s1809_s6 = smov (%p31_p0, %s30_s6), 0  ;;  %s1811_s7 = smov (!%p31_p0, %s33_s7), %s1335_s27 }
   0xf   : > { %1785 = sst [smem:[#allocation11_spill]] %s1809_s6  ;;  %p1451_p3 = por %p48_p2, %p47_p1 }
  0x10   : > { %p53_p4 = scmp.ne.s32.totalorder %s1315_s22, %s1311_s21  ;;  %p35_p5 = scmp.ge.s32.totalorder %s1811_s7, 2 }
  0x11   : > { %p54_p6 = scmp.eq.s32.totalorder %s960_s29, 0  ;;  %s148_s10 = ssub.s32 %s1331_s26, %s1809_s6 }
  0x12   : > { %s152_s11 = sadd.s32 1, %s1307_s20  ;;  %s1813_s7 = smov (%p35_p5, %s1811_s7), 0 }
  0x13   : > { %1787 = sst [smem:[#allocation12_spill]] %s1813_s7  ;;  %p1461_p7 = por %p54_p6, %p53_p4 }
  0x14   : > { %p162_p8 = scmp.ne.s32.totalorder %s1307_s20, %s1303_s19  ;;  %s37_s13 = ssub.s32 %s1335_s27, %s1813_s7 }
  0x15   : > { %p163_p9 = scmp.eq.s32.totalorder %s960_s29, 3  ;;  %p38_p10 = scmp.eq.s32.totalorder %s37_s13, 0 }
  0x16   : > { %s149_s14 = sor.u32 %s148_s10, %s37_s13  ;;  %p168_p13 = scmp.ne.s32.totalorder %s1303_s19, %s1299_s18 }
  0x17   : > { %p150_p11 = scmp.eq.s32.totalorder %s149_s14, 0  ;;  %p1469_p12 = por %p163_p9, %p162_p8 }
  0x18   : > { %s1474_s16 = scalar_select %p38_p10, %s1319_s23, %s40_s8  }
  0x19   : > { %s1477_s17 = scalar_select %p150_p11, %s1307_s20, %s152_s11  }
  0x1a   : > { %1790 = sst [smem:[#allocation13_spill]] %s1474_s16  ;;  %p169_p0 = scmp.eq.s32.totalorder %s961_s30, 3 }
  0x1b   : > { %1791 = sst [smem:[#allocation14_spill]] %s1477_s17  ;;  %p1074_p1 = scmp.lt.s32.totalorder %s1339_s28, 4 }
  0x1c   : > { %p1482_p2 = por %p169_p0, %p168_p13  ;;  %s201_s29 = sand.u32 1, %s1319_s23  }
  0x1d   : > { %s964_s10 = sshll.u32 %s201_s29, 6  ;;  %s989_s13 = sshll.u32 %s1335_s27, 6 }
  0x1e   : > { %s210_s6 = scalar_lea.hbm %s1772_s0, %s989_s13  ;;  %s205_s8 = scalar_lea.vmem [#allocation3], %s964_s10 }
  0x1f   : > { %s213_s26 = sshll.u32 %s205_s8, 4  ;;  %s211_s16 = sshll.u32 %s210_s6, 4  ;;  %s214_s26 = int_to_ptr.vmem [resolvable:$true] %s213_s26  ;;  %s212_s16 = int_to_ptr.hbm [resolvable:$true] %s211_s16 }
  0x20   : > { %p1067_p4 = pnand %p1074_p1, %p1451_p3  ;;  %p967_p5 = scmp.ge.s32.totalorder %s1339_s28, 1 }
  0x21   : > { %s202_s30 = scalar_lea.sflag [#allocation4], %s201_s29  ;;  %s1341_s11 = smov 128  }
  0x22   : > { %s1342_s17 = smov 8   ;;  %p221_p6 = scmp.lt.s32.totalorder %s1339_s28, 5 }
  0x23   : > { %1069 = dma.hbm_to_vmem [thread:$0]  (!%p1067_p4), %s212_s16, 1024, %s214_s26, %s202_s30, %s1341_s11, %s1341_s11, %s1342_s17  }
  0x24   : > { %p222_p8 = pnand %p967_p5, %p221_p6 }
  0x25   : > { %s227_s27 = sand.u32 (!%p222_p8), 1, %s1315_s22  }
  0x26   : > { %225 = sbr.rel (%p222_p8) target bundleno = 827 (0x33b), region = 40  ;;  %s968_s7 = sshll.u32 (!%p222_p8), %s227_s27, 6 }
  0x27   : > { %s228_s13 = scalar_lea.sflag (!%p222_p8), [#allocation4], %s227_s27  ;;  %s231_s10 = scalar_lea.vmem (!%p222_p8), [#allocation3], %s968_s7 }
  0x2b   : > { %1290 = dma.done.wait (%p1461_p7), %s228_s13, 1024  }
  0x2c   : > { %1292 = vsyncadd (%p1461_p7), %s228_s13, 4294966272  ;;  %s1782_s6 = sand.u32 1, %s1303_s19   ;;  %p970_p3 = scmp.ne.s32.totalorder %s1323_s24, 0 }
  0x2d   : > { %s1503_s9 = sshll.u32 %s1782_s6, 3  ;;  %s1343_s27 = smov (!%p970_p3), 1  }
  0x2e   : > { %262 = sbr.rel (%p970_p3) target bundleno = 185 (0xb9), region = 48 }
  0x33   : > { %v279_v0 = vld [vmem:[%s231_s10 + $0x10] sm:$0xff]  ;;  %v277_v1 = vld [vmem:[%s231_s10] sm:$0xff]  ;;  %v280_v3 = vld [vmem:[%s231_s10 + $0x18] sm:$0xff]  ;;  %vm263_vm0 = vcmask 146432   ;;  %v1344_v8 = vmov 0.0   ;;  %vm266_vm1 = vcmask 140288  }
  0x34   : > { %297 = vrot.lane.b32.xlu1 %v279_v0, %s1343_s27  ;;  %293 = vrot.lane.b32.xlu0 %v277_v1, %s1343_s27  ;;  %v281_v2 = vld [vmem:[%s231_s10 + $0x20] sm:$0xff]  ;;  %v278_v4 = vld [vmem:[%s231_s10 + $0x8] sm:$0xff]  ;;  %268 = vst.msk [vmem:[#allocation2 + $0x18] sm:$0xff] %vm263_vm0, %v1344_v8  ;;  %vm317_vm2 = vcmask 138248  }
  0x35   : > { %301 = vrot.lane.b32.xlu2 %v281_v2, %s1343_s27  ;;  %v282_v5 = vld [vmem:[%s231_s10 + $0x28] sm:$0xff]  ;;  %v284_v6 = vld [vmem:[%s231_s10 + $0x38] sm:$0xff]  ;;  %v283_v7 = vld [vmem:[%s231_s10 + $0x30] sm:$0xff]  ;;  %269 = vst.msk [vmem:[#allocation2 + $0x20] sm:$0xff] %vm263_vm0, %v1344_v8 }
  0x36   : > { %264 = vst.msk [vmem:[#allocation2] sm:$0xff] %vm263_vm0, %v1344_v8 }
  0x37   : > { %265 = vst.msk [vmem:[#allocation2 + $0x8] sm:$0xff] %vm263_vm0, %v1344_v8 }
  0x38   : > { %271 = vst.msk [vmem:[#allocation2 + $0x30] sm:$0xff] %vm263_vm0, %v1344_v8 }
  0x39   : > { %272 = vst.msk [vmem:[#allocation2 + $0x38] sm:$0xff] %vm263_vm0, %v1344_v8 }
  0x3a   : > { %274 = vst.msk [vmem:[#allocation2 + $0x48] sm:$0xff] %vm263_vm0, %v1344_v8 }
  0x3b   : > { %275 = vst.msk [vmem:[#allocation2 + $0x50] sm:$0xff] %vm263_vm0, %v1344_v8 }
  0x3c   : > { %299 = vrot.lane.b32.xlu1 %v280_v3, %s1343_s27  ;;  %295 = vrot.lane.b32.xlu0 %v278_v4, %s1343_s27  ;;  %270 = vst.msk [vmem:[#allocation2 + $0x28] sm:$0x3] %vm266_vm1, %v1344_v8 }
  0x3d   : > { %303 = vrot.lane.b32.xlu2 %v282_v5, %s1343_s27  ;;  %267 = vst.msk [vmem:[#allocation2 + $0x10] sm:$0x3] %vm266_vm1, %v1344_v8 }
  0x3e   : > { %273 = vst.msk [vmem:[#allocation2 + $0x40] sm:$0x3] %vm266_vm1, %v1344_v8 }
  0x3f   : > { %276 = vst.msk [vmem:[#allocation2 + $0x58] sm:$0x3] %vm266_vm1, %v1344_v8 }
  0x44   : > { %307 = vrot.lane.b32.xlu1 %v284_v6, %s1343_s27  ;;  %305 = vrot.lane.b32.xlu0 %v283_v7, %s1343_s27 }
  0x8f   : > { %v302_v9 = vpop.permute.xlu2 %301 }
  0x90   : > { %322 = vst.msk [vmem:[#allocation2 + $0x31] sm:$0xff] %vm317_vm2, %v302_v9 }
  0x97   : > { %v304_v10 = vpop.permute.xlu2 %303 }
  0x98   : > { %323 = vst.msk [vmem:[#allocation2 + $0x39] sm:$0xff] %vm317_vm2, %v304_v10 }
  0xa6   : > { %v298_v11 = vpop.permute.xlu1 %297  ;;  %v294_v12 = vpop.permute.xlu0 %293 }
  0xa7   : > { %320 = vst.msk [vmem:[#allocation2 + $0x19] sm:$0xff] %vm317_vm2, %v298_v11 }
  0xa8   : > { %318 = vst.msk [vmem:[#allocation2 + $0x1] sm:$0xff] %vm317_vm2, %v294_v12 }
  0xae   : > { %v300_v13 = vpop.permute.xlu1 %299  ;;  %v296_v14 = vpop.permute.xlu0 %295 }
  0xaf   : > { %321 = vst.msk [vmem:[#allocation2 + $0x21] sm:$0xff] %vm317_vm2, %v300_v13 }
  0xb0   : > { %319 = vst.msk [vmem:[#allocation2 + $0x9] sm:$0xff] %vm317_vm2, %v296_v14 }
  0xb6   : > { %v308_v15 = vpop.permute.xlu1 %307  ;;  %v306_v16 = vpop.permute.xlu0 %305 }
  0xb7   : > { %325 = vst.msk [vmem:[#allocation2 + $0x51] sm:$0xff] %vm317_vm2, %v308_v15 }
  0xb8   : > { %324 = vst.msk [vmem:[#allocation2 + $0x49] sm:$0xff] %vm317_vm2, %v306_v16 }
  0xb9 PF: > { %v329_v17 = vld [vmem:[%s1773_s1 + $0x8] sm:$0x7]  ;;  %v327_v18 = vld [vmem:[%s1773_s1] sm:$0x7]  ;;  %s1345_s14 = smov 127   ;;  %s1346_s11 = smov 126  }
  0xba   : > { %364 = vrot.lane.b32.xlu1 %v329_v17, %s1345_s14  ;;  %360 = vrot.lane.b32.xlu0 %v327_v18, %s1345_s14  ;;  %v328_v19 = vld [vmem:[%s1773_s1 + $0x4] sm:$0x7]  ;;  %990 = vpush %v327_v18  ;;  %v330_v20 = vld [vmem:[%s1773_s1 + $0xc] sm:$0x7]  ;;  %v454_v21 = vrot.slane %v327_v18, 1  ;;  %v456_v22 = vrot.slane %v329_v17, 1 }
  0xbb   : > { %404 = vrot.lane.b32.xlu2 %v327_v18, %s1346_s11  ;;  %992 = vpush %v328_v19  ;;  %v455_v23 = vrot.slane %v328_v19, 1  ;;  %v457_v24 = vrot.slane %v330_v20, 1  ;;  %v1542_v25 = vrot.slane %v327_v18, 2  ;;  %v1544_v26 = vrot.slane %v328_v19, 2  ;;  %s971_s12 = sshll.u32 %s1323_s24, 3 }
  0xbc   : > { %994 = vpush %v329_v17  ;;  %v1551_v27 = vrot.slane %v330_v20, 2  ;;  %v574_v28 = vrot.slane %v329_v17, 2  ;;  %s1570_s29 = scalar_lea.vmem [#allocation2], %s971_s12  ;;  %v1183_v42 = vld [vmem:[%s1774_s2 + $0x3] ss:$0 sm:$0xff]  ;;  %v1347_v43 = vmov 0  }
  0xbd   : > { %996 = vpush %v330_v20  ;;  %1180 = vset.pattern.permute.xlu2 %v1347_v43  ;;  %1181 = vset.pattern.permute.xlu1 %v1347_v43  ;;  %vm717_vm3 = vcmask 1047556   ;;  %vm801_vm4 = vcmask 130048   ;;  %vm803_vm5 = vcmask 261120   ;;  %vm805_vm6 = vcmask 392192  }
  0xbe   : > { %1182 = vset.pattern.permute.xlu0 %v1347_v43  ;;  %vm807_vm7 = vcmask 523264   ;;  %vm809_vm8 = vcmask 654336   ;;  %vm811_vm9 = vcmask 785408   ;;  %vm813_vm10 = vcmask 916480  }
  0xbf   : > { %v1573_v39 = vld [vmem:[%s1570_s29 + $0x48] sm:$0xff]  ;;  %v1585_v58 = vld [vmem:[%s1570_s29 + $0x18] sm:$0xff]  ;;  %v1588_v59 = vld [vmem:[%s1570_s29 + $0x30] sm:$0xff]  ;;  %vm826_vm11 = vcmask 1043456   ;;  %vm822_vm12 = vcmask 31744  }
  0xc0   : > { %v1599_v2 = vld [vmem:[%s1570_s29] sm:$0xff]  ;;  %v975_v15 = vld [vmem:[%s1570_s29 + $0x31] sm:$0xff]  ;;  %v976_v18 = vld [vmem:[%s1570_s29 + $0x49] sm:$0xff] }
  0xc1   : > { %v1607_v9 = vld [vmem:[%s1570_s29 + $0x1] sm:$0xff]  ;;  %v974_v12 = vld [vmem:[%s1570_s29 + $0x19] sm:$0xff] }
  0xc2   : > { %366 = vrot.lane.b32.xlu1 %v330_v20, %s1345_s14  ;;  %362 = vrot.lane.b32.xlu0 %v328_v19, %s1345_s14 }
  0xc3   : > { %406 = vrot.lane.b32.xlu2 %v328_v19, %s1346_s11 }
  0xca   : > { %410 = vrot.lane.b32.xlu1 %v330_v20, %s1346_s11  ;;  %408 = vrot.lane.b32.xlu0 %v329_v17, %s1346_s11 }
  0xcb   : > { %478 = vrot.lane.b32.xlu2 %v454_v21, %s1345_s14 }
  0xd2   : > { %482 = vrot.lane.b32.xlu1 %v456_v22, %s1345_s14  ;;  %480 = vrot.lane.b32.xlu0 %v455_v23, %s1345_s14 }
  0xd3   : > { %484 = vrot.lane.b32.xlu2 %v457_v24, %s1345_s14 }
  0xda   : > { %524 = vrot.lane.b32.xlu1 %v455_v23, %s1346_s11  ;;  %522 = vrot.lane.b32.xlu0 %v454_v21, %s1346_s11 }
  0xdb   : > { %526 = vrot.lane.b32.xlu2 %v456_v22, %s1346_s11 }
  0xe2   : > { %596 = vrot.lane.b32.xlu1 %v1542_v25, %s1345_s14  ;;  %528 = vrot.lane.b32.xlu0 %v457_v24, %s1346_s11 }
  0xe3   : > { %598 = vrot.lane.b32.xlu2 %v1544_v26, %s1345_s14 }
  0xea   : > { %602 = vrot.lane.b32.xlu1 %v1551_v27, %s1345_s14  ;;  %600 = vrot.lane.b32.xlu0 %v574_v28, %s1345_s14 }
  0xeb   : > { %640 = vrot.lane.b32.xlu2 %v1542_v25, %s1346_s11  ;;  %s1563_s10 = spop %990 }
  0xec   : > { %s1565_s27 = spop %992 }
  0xed   : > { %s1568_s16 = spop %994 }
  0xee   : > { %s997_s17 = spop %996 }
  0xef   : > { %v350_v40 = vstv %s997_s17 }
  0xf0   : > { %v1576_v41 = vmul.f32 %v350_v40, %v1573_v39  ;;  %v979_v40 = vld [vmem:[%s1570_s29 + $0x1a] sm:$0xff] }
  0xf2   : > { %644 = vrot.lane.b32.xlu1 %v574_v28, %s1346_s11  ;;  %642 = vrot.lane.b32.xlu0 %v1544_v26, %s1346_s11 }
  0xf3   : > { %646 = vrot.lane.b32.xlu2 %v1551_v27, %s1346_s11 }
  0xfb   : > { %709 = vperm.xlu2 %1180, %v1183_v42  }
 0x115   : > { %v405_v29 = vpop.permute.xlu2 %404 }
 0x11d   : > { %v407_v30 = vpop.permute.xlu2 %406 }
 0x125   : > { %v479_v33 = vpop.permute.xlu2 %478 }
 0x12c   : > { %v365_v31 = vpop.permute.xlu1 %364  ;;  %v361_v32 = vpop.permute.xlu0 %360 }
 0x12d   : > { %998 = vpush %v361_v32  ;;  %v485_v36 = vpop.permute.xlu2 %484 }
 0x134   : > { %v367_v34 = vpop.permute.xlu1 %366  ;;  %v363_v35 = vpop.permute.xlu0 %362 }
 0x135   : > { %1000 = vpush %v363_v35  ;;  %v527_v46 = vpop.permute.xlu2 %526 }
 0x136   : > { %1002 = vpush %v365_v31 }
 0x137   : > { %1004 = vpush %v367_v34 }
 0x138   : > { %1006 = vpush %v405_v29 }
 0x139   : > { %1008 = vpush %v407_v30 }
 0x13c   : > { %v411_v37 = vpop.permute.xlu1 %410  ;;  %v409_v38 = vpop.permute.xlu0 %408 }
 0x13d   : > { %1010 = vpush %v409_v38  ;;  %v599_v49 = vpop.permute.xlu2 %598  ;;  %v980_v38 = vld [vmem:[%s1570_s29 + $0x32] sm:$0xff] }
 0x13e   : > { %1012 = vpush %v411_v37 }
 0x13f   : > { %1014 = vpush %v454_v21 }
 0x140   : > { %1016 = vpush %v455_v23 }
 0x141   : > { %1018 = vpush %v456_v22 }
 0x142   : > { %1020 = vpush %v457_v24 }
 0x143   : > { %1022 = vpush %v479_v33 }
 0x144   : > { %v483_v44 = vpop.permute.xlu1 %482  ;;  %v481_v45 = vpop.permute.xlu0 %480 }
 0x145   : > { %1024 = vpush %v481_v45  ;;  %v641_v52 = vpop.permute.xlu2 %640 }
 0x146   : > { %1026 = vpush %v483_v44 }
 0x147   : > { %1028 = vpush %v485_v36  ;;  %v978_v36 = vld [vmem:[%s1570_s29 + $0x2] sm:$0xff] }
 0x14c   : > { %v525_v47 = vpop.permute.xlu1 %524  ;;  %v523_v48 = vpop.permute.xlu0 %522 }
 0x14d   : > { %1030 = vpush %v523_v48  ;;  %v647_v55 = vpop.permute.xlu2 %646 }
 0x14e   : > { %1032 = vpush %v525_v47  ;;  %v981_v47 = vld [vmem:[%s1570_s29 + $0x4a] sm:$0xff] }
 0x14f   : > { %1034 = vpush %v527_v46 }
 0x154   : > { %v597_v50 = vpop.permute.xlu1 %596  ;;  %v529_v51 = vpop.permute.xlu0 %528 }
 0x155   : > { %1036 = vpush %v529_v51 }
 0x156   : > { %1038 = vpush %v1542_v25 }
 0x157   : > { %1040 = vpush %v1544_v26 }
 0x158   : > { %1042 = vpush %v574_v28 }
 0x159   : > { %1044 = vpush %v1551_v27 }
 0x15a   : > { %1046 = vpush %v597_v50 }
 0x15b   : > { %1048 = vpush %v599_v49 }
 0x15c   : > { %v603_v53 = vpop.permute.xlu1 %602  ;;  %v601_v54 = vpop.permute.xlu0 %600 }
 0x15d   : > { %1050 = vpush %v601_v54 }
 0x15e   : > { %1052 = vpush %v603_v53  ;;  %s999_s7 = spop %998 }
 0x15f   : > { %1054 = vpush %v641_v52  ;;  %v369_v3 = vstv %s999_s7 }
 0x160   : > { %v380_v5 = vmul.f32 %v369_v3, %v1599_v2 }
 0x164   : > { %v645_v56 = vpop.permute.xlu1 %644  ;;  %v643_v57 = vpop.permute.xlu0 %642 }
 0x165   : > { %1056 = vpush %v643_v57 }
 0x166   : > { %1058 = vpush %v645_v56  ;;  %s1001_s13 = spop %1000 }
 0x167   : > { %1060 = vpush %v647_v55  ;;  %v372_v60 = vstv %s1001_s13  ;;  %s1003_s12 = spop %1002 }
 0x168   : > { %v381_v61 = vmul.f32 %v372_v60, %v1585_v58  ;;  %v375_v62 = vstv %s1003_s12  ;;  %s1005_s17 = spop %1004 }
 0x169   : > { %v382_v63 = vmul.f32 %v375_v62, %v1588_v59  ;;  %v378_v0 = vstv %s1005_s17  ;;  %s1593_s8 = spop %1006 }
 0x16a   : > { %v383_v1 = vmul.f32 %v378_v0, %v1573_v39  ;;  %390 = vrot.lane.b32.xlu1 %v381_v61, %s1345_s14  ;;  %s1009_s30 = spop %1008  ;;  %v413_v20 = vstv %s1593_s8 }
 0x16b   : > { %392 = vrot.lane.b32.xlu2 %v382_v63, %s1345_s14  ;;  %v416_v4 = vstv %s1009_s30  ;;  %v424_v23 = vmul.f32 %v413_v20, %v1599_v2 }
 0x16c   : > { %394 = vrot.lane.b32.xlu0 %v383_v1, %s1345_s14  ;;  %v425_v7 = vmul.f32 %v416_v4, %v1585_v58 }
 0x16e   : > { %s1601_s13 = spop %1010 }
 0x16f   : > { %s1013_s12 = spop %1012  ;;  %v419_v22 = vstv %s1601_s13 }
 0x170   : > { %v422_v6 = vstv %s1013_s12  ;;  %s1015_s17 = spop %1014  ;;  %v426_v25 = vmul.f32 %v419_v22, %v1588_v59 }
 0x171   : > { %v427_v8 = vmul.f32 %v422_v6, %v1573_v39  ;;  %v459_v10 = vstv %s1015_s17  ;;  %s1017_s6 = spop %1016 }
 0x172   : > { %388 = vrot.lane.b32.xlu1 %v380_v5, %s1345_s14  ;;  %v1611_v11 = vmul.f32 %v1607_v9, %v459_v10  ;;  %v462_v13 = vstv %s1017_s6  ;;  %s1019_s7 = spop %1018 }
 0x173   : > { %434 = vrot.lane.b32.xlu2 %v425_v7, %s1346_s11  ;;  %v1615_v14 = vmul.f32 %v974_v12, %v462_v13  ;;  %v465_v16 = vstv %s1019_s7  ;;  %s1021_s30 = spop %1020  ;;  %v1184_v7 = vld [vmem:[%s1774_s2 + $0x2] ss:$0 sm:$0xff]  ;;  %v710_v13 = vpop.permute.xlu2 %709 }
 0x174   : > { %438 = vrot.lane.b32.xlu0 %v427_v8, %s1346_s11  ;;  %v1619_v17 = vmul.f32 %v975_v15, %v465_v16  ;;  %v468_v19 = vstv %s1021_s30  ;;  %s1625_s12 = spop %1022  ;;  %v342_v16 = vstv %s1565_s27  ;;  %s1352_s27 = smov 80  }
 0x175   : > { %v1623_v21 = vmul.f32 %v976_v18, %v468_v19  ;;  %v487_v32 = vstv %s1625_s12 }
 0x176   : > { %s1025_s6 = spop %1024  ;;  %v498_v43 = vmul.f32 %v1607_v9, %v487_v32  ;;  %v346_v32 = vstv %s1568_s16  ;;  %s1353_s16 = smov 64  }
 0x177   : > { %s1027_s17 = spop %1026  ;;  %v490_v28 = vstv %s1025_s6 }
 0x178   : > { %s1029_s26 = spop %1028  ;;  %v493_v27 = vstv %s1027_s17  ;;  %v499_v30 = vmul.f32 %v974_v12, %v490_v28 }
 0x179   : > { %v496_v24 = vstv %s1029_s26  ;;  %v500_v29 = vmul.f32 %v975_v15, %v493_v27 }
 0x17a   : > { %432 = vrot.lane.b32.xlu1 %v424_v23, %s1346_s11  ;;  %v501_v26 = vmul.f32 %v976_v18, %v496_v24 }
 0x17c   : > { %436 = vrot.lane.b32.xlu0 %v426_v25, %s1346_s11  ;;  %512 = vrot.lane.b32.xlu2 %v501_v26, %s1345_s14 }
 0x17e   : > { %s1633_s8 = spop %1030 }
 0x17f   : > { %s1033_s26 = spop %1032  ;;  %v531_v51 = vstv %s1633_s8 }
 0x180   : > { %v534_v31 = vstv %s1033_s26  ;;  %s1637_s13 = spop %1034  ;;  %v542_v55 = vmul.f32 %v1607_v9, %v531_v51  ;;  %v1185_v9 = vld [vmem:[%s1774_s2 + $0x1] ss:$0 sm:$0xff] }
 0x181   : > { %v543_v34 = vmul.f32 %v974_v12, %v534_v31  ;;  %v537_v50 = vstv %s1637_s13  ;;  %v1186_v12 = vld [vmem:[%s1774_s2] ss:$0 sm:$0xff] }
 0x182   : > { %510 = vrot.lane.b32.xlu1 %v500_v29, %s1345_s14  ;;  %v544_v52 = vmul.f32 %v975_v15, %v537_v50  ;;  %v338_v29 = vstv %s1563_s10  ;;  %s1351_s10 = smov 16  }
 0x184   : > { %508 = vrot.lane.b32.xlu0 %v499_v30, %s1345_s14 }
 0x186   : > { %s1037_s7 = spop %1036 }
 0x187   : > { %v540_v33 = vstv %s1037_s7  ;;  %s1039_s30 = spop %1038 }
 0x188   : > { %v545_v35 = vmul.f32 %v976_v18, %v540_v33  ;;  %v577_v37 = vstv %s1039_s30  ;;  %s1041_s6 = spop %1040  ;;  %v353_v18 = vmul.f32 %v342_v16, %v1585_v58  ;;  %v352_v33 = vmul.f32 %v338_v29, %v1599_v2 }
 0x189   : > { %v1642_v39 = vmul.f32 %v978_v36, %v577_v37  ;;  %v580_v42 = vstv %s1041_s6  ;;  %s1043_s17 = spop %1042  ;;  %v354_v58 = vmul.f32 %v346_v32, %v1588_v59 }
 0x18a   : > { %556 = vrot.lane.b32.xlu2 %v545_v35, %s1346_s11  ;;  %552 = vrot.lane.b32.xlu1 %v543_v34, %s1346_s11  ;;  %v1648_v44 = vmul.f32 %v979_v40, %v580_v42  ;;  %v583_v45 = vstv %s1043_s17  ;;  %s1045_s12 = spop %1044 }
 0x18b   : > { %v1650_v46 = vmul.f32 %v980_v38, %v583_v45  ;;  %v586_v48 = vstv %s1045_s12  ;;  %s1653_s26 = spop %1046  ;;  %s1356_s12 = smov 96  }
 0x18c   : > { %506 = vrot.lane.b32.xlu0 %v498_v43, %s1345_s14  ;;  %v1656_v49 = vmul.f32 %v981_v47, %v586_v48  ;;  %s1049_s7 = spop %1048  ;;  %v605_v0 = vstv %s1653_s26 }
 0x18d   : > { %v608_v56 = vstv %s1049_s7  ;;  %v616_v4 = vmul.f32 %v978_v36, %v605_v0 }
 0x18e   : > { %s1051_s30 = spop %1050  ;;  %v617_v60 = vmul.f32 %v979_v40, %v608_v56 }
 0x18f   : > { %s1053_s6 = spop %1052  ;;  %v611_v57 = vstv %s1051_s30 }
 0x190   : > { %v614_v53 = vstv %s1053_s6  ;;  %s1055_s29 = spop %1054  ;;  %v618_v62 = vmul.f32 %v980_v38, %v611_v57  ;;  %s985_s6 = sshll.u32 %s1327_s25, 1 }
 0x191   : > { %v619_v54 = vmul.f32 %v981_v47, %v614_v53  ;;  %v649_v8 = vstv %s1055_s29  ;;  %s862_s26 = sadd.s32 %s1323_s24, %s985_s6  ;;  %s1237_s6 = scalar_lea.hbm %s1777_s5, 32 }
 0x192   : > { %554 = vrot.lane.b32.xlu2 %v544_v52, %s1346_s11  ;;  %v660_v10 = vmul.f32 %v978_v36, %v649_v8 }
 0x193   : > { %630 = vrot.lane.b32.xlu1 %v619_v54, %s1345_s14 }
 0x194   : > { %550 = vrot.lane.b32.xlu0 %v542_v55, %s1346_s11 }
 0x196   : > { %s1057_s17 = spop %1056 }
 0x197   : > { %s1059_s13 = spop %1058  ;;  %v652_v1 = vstv %s1057_s17 }
 0x198   : > { %s1061_s8 = spop %1060  ;;  %v655_v3 = vstv %s1059_s13  ;;  %v661_v5 = vmul.f32 %v979_v40, %v652_v1  ;;  %s1354_s13 = smov 48  }
 0x199   : > { %v658_v61 = vstv %s1061_s8  ;;  %v662_v6 = vmul.f32 %v980_v38, %v655_v3  ;;  %s1355_s8 = smov 112  }
 0x19a   : > { %v663_v63 = vmul.f32 %v981_v47, %v658_v61  ;;  %626 = vrot.lane.b32.xlu2 %v617_v60, %s1345_s14 }
 0x19c   : > { %628 = vrot.lane.b32.xlu0 %v618_v62, %s1345_s14  ;;  %674 = vrot.lane.b32.xlu1 %v663_v63, %s1346_s11 }
 0x1a2   : > { %624 = vrot.lane.b32.xlu2 %v616_v4, %s1345_s14  ;;  %s986_s14 = sshll.u32 %s862_s26, 3 }
 0x1a4   : > { %670 = vrot.lane.b32.xlu0 %v661_v5, %s1346_s11  ;;  %672 = vrot.lane.b32.xlu1 %v662_v6, %s1346_s11 }
 0x1aa   : > { %705 = vperm.xlu2 %1180, %v1184_v7  }
 0x1ac   : > { %668 = vrot.lane.b32.xlu0 %v660_v10, %s1346_s11  ;;  %701 = vperm.xlu1 %1181, %v1185_v9   ;;  %s1350_s11 = smov 32  }
 0x1b4   : > { %697 = vperm.xlu0 %1182, %v1186_v12  }
 0x1c5   : > { %v393_v15 = vpop.permute.xlu2 %392 }
 0x1c6   : > { %v402_v40 = vadd.f32 %v393_v15, %v354_v58 }
 0x1cd   : > { %v435_v19 = vpop.permute.xlu2 %434 }
 0x1d6   : > { %v513_v26 = vpop.permute.xlu2 %512 }
 0x1dc   : > { %v391_v20 = vpop.permute.xlu1 %390 }
 0x1dd   : > { %v401_v22 = vadd.f32 %v391_v20, %v353_v18 }
 0x1de   : > { %v395_v23 = vpop.permute.xlu0 %394 }
 0x1df   : > { %v445_v24 = vadd.f32 %v435_v19, %v401_v22  ;;  %v403_v28 = vadd.f32 %v395_v23, %v1576_v41 }
 0x1e1   : > { %v475_v25 = vadd.f32 %v1615_v14, %v445_v24 }
 0x1e4   : > { %v389_v27 = vpop.permute.xlu1 %388  ;;  %v557_v37 = vpop.permute.xlu2 %556 }
 0x1e5   : > { %v400_v36 = vadd.f32 %v389_v27, %v352_v33  ;;  %v1349_v27 = vmov 1934713408  }
 0x1e6   : > { %v439_v30 = vpop.permute.xlu0 %438 }
 0x1e7   : > { %v447_v31 = vadd.f32 %v439_v30, %v403_v28  ;;  %v746_v28 = vunpack.c.l.s4 %v1349_v27 }
 0x1e9   : > { %v477_v34 = vadd.f32 %v1623_v21, %v447_v31 }
 0x1eb   : > { %v521_v35 = vadd.f32 %v513_v26, %v477_v34 }
 0x1ec   : > { %v433_v38 = vpop.permute.xlu1 %432  ;;  %v555_v21 = vpop.permute.xlu2 %554 }
 0x1ed   : > { %v565_v14 = vadd.f32 %v557_v37, %v521_v35  ;;  %v444_v42 = vadd.f32 %v433_v38, %v400_v36  ;;  %v747_v35 = vunpack.c.0.s8 %v746_v28 }
 0x1ee   : > { %v437_v43 = vpop.permute.xlu0 %436 }
 0x1ef   : > { %v446_v45 = vadd.f32 %v437_v43, %v402_v40  ;;  %v474_v41 = vadd.f32 %v1611_v11, %v444_v42  ;;  %v595_v47 = vadd.f32 %v1656_v49, %v565_v14 }
 0x1f1   : > { %v476_v48 = vadd.f32 %v1619_v17, %v446_v45 }
 0x1f4   : > { %v511_v2 = vpop.permute.xlu1 %510  ;;  %v627_v17 = vpop.permute.xlu2 %626 }
 0x1f5   : > { %v520_v50 = vadd.f32 %v511_v2, %v476_v48 }
 0x1f6   : > { %v509_v51 = vpop.permute.xlu0 %508 }
 0x1f7   : > { %v564_v59 = vadd.f32 %v555_v21, %v520_v50  ;;  %v519_v53 = vadd.f32 %v509_v51, %v475_v25 }
 0x1f9   : > { %v594_v52 = vadd.f32 %v1650_v46, %v564_v59 }
 0x1fc   : > { %v553_v54 = vpop.permute.xlu1 %552  ;;  %v625_v46 = vpop.permute.xlu2 %624 }
 0x1fd   : > { %v563_v55 = vadd.f32 %v553_v54, %v519_v53 }
 0x1fe   : > { %v507_v56 = vpop.permute.xlu0 %506 }
 0x1ff   : > { %v593_v57 = vadd.f32 %v1648_v44, %v563_v55  ;;  %v518_v60 = vadd.f32 %v507_v56, %v474_v41  ;;  %v1348_v44 = vmov 1983009808  }
 0x200   : > { %v722_v12 = vunpack.c.l.s4 %v1348_v44 }
 0x201   : > { %v637_v7 = vadd.f32 %v627_v17, %v593_v57  ;;  %v816_v57 = vld [vmem:[%s1776_s4] sm:$0xff] }
 0x202   : > { %v723_v23 = vunpack.c.0.s8 %v722_v12 }
 0x204   : > { %v706_v22 = vpop.permute.xlu2 %705 }
 0x205   : > { %v631_v61 = vpop.permute.xlu1 %630 }
 0x206   : > { %v551_v11 = vpop.permute.xlu0 %550  ;;  %v639_v1 = vadd.f32 %v631_v61, %v595_v47 }
 0x207   : > { %v562_v62 = vadd.f32 %v551_v11, %v518_v60 }
 0x209   : > { %v592_v49 = vadd.f32 %v1642_v39, %v562_v62 }
 0x20b   : > { %v636_v25 = vadd.f32 %v625_v46, %v592_v49 }
 0x20e   : > { %v629_v63 = vpop.permute.xlu0 %628  ;;  %v675_v0 = vpop.permute.xlu1 %674 }
 0x20f   : > { %v683_v5 = vadd.f32 %v675_v0, %v639_v1  ;;  %v638_v8 = vadd.f32 %v629_v63, %v594_v52 }
 0x211   : > { %v715_v6 = vadd.f32 %v710_v13, %v683_v5 }
 0x213   : > { %v729_v16 = vrot.slane %v715_v6, 4 }
 0x216   : > { %v671_v3 = vpop.permute.xlu0 %670  ;;  %v673_v4 = vpop.permute.xlu1 %672 }
 0x217   : > { %v681_v9 = vadd.f32 %v671_v3, %v637_v7  ;;  %v682_v18 = vadd.f32 %v673_v4, %v638_v8  ;;  %v815_v8 = vld [vmem:[%s1775_s3] sm:$0xff] }
 0x219   : > { %v714_v24 = vadd.f32 %v706_v22, %v682_v18 }
 0x21b   : > { %v716_v31 = vrot.slane %v714_v24, 4 }
 0x21e   : > { %v669_v10 = vpop.permute.xlu0 %668  ;;  %v702_v15 = vpop.permute.xlu1 %701 }
 0x21f   : > { %v713_v39 = vadd.f32 %v702_v15, %v681_v9  ;;  %v680_v26 = vadd.f32 %v669_v10, %v636_v25 }
 0x221   : > { %v730_v19 = vsel %vm717_vm3, %v729_v16, %v713_v39  ;;  %v731_v20 = vrot.slane %v713_v39, 4 }
 0x222   : > { %v736_v29 = vperm.slane %v730_v19, %v723_v23 }
 0x223   : > { %v732_v13 = vsel %vm717_vm3, %v715_v6, %v731_v20 }
 0x224   : > { %v740_v33 = vperm.slane %v732_v13, %v723_v23  ;;  %v741_v36 = vrot.slane %v736_v29, 4 }
 0x226   : > { %v698_v30 = vpop.permute.xlu0 %697  ;;  %v753_v40 = vrot.slane %v740_v33, 4 }
 0x227   : > { %v712_v32 = vadd.f32 %v698_v30, %v680_v26 }
 0x229   : > { %v718_v34 = vsel %vm717_vm3, %v716_v31, %v712_v32  ;;  %v719_v58 = vrot.slane %v712_v32, 4 }
 0x22a   : > { %v724_v37 = vperm.slane %v718_v34, %v723_v23 }
 0x22b   : > { %v720_v38 = vsel %vm717_vm3, %v714_v24, %v719_v58 }
 0x22c   : > { %v728_v14 = vperm.slane %v720_v38, %v723_v23  ;;  %v743_v42 = vrot.slane %v724_v37, 4  ;;  %v742_v43 = vsel %vm717_vm3, %v741_v36, %v724_v37 }
 0x22d   : > { %v748_v45 = vperm.slane %v742_v43, %v747_v35 }
 0x22e   : > { %v755_v41 = vrot.slane %v728_v14, 4  ;;  %v744_v47 = vsel %vm717_vm3, %v736_v29, %v743_v42  ;;  %v754_v48 = vsel %vm717_vm3, %v753_v40, %v728_v14 }
 0x22f   : > { %v752_v2 = vperm.slane %v744_v47, %v747_v35  ;;  %v765_v50 = vrot.slane %v748_v45, 4  ;;  %v760_v21 = vperm.slane %v754_v48, %v747_v35 }
 0x230   : > { %v756_v51 = vsel %vm717_vm3, %v740_v33, %v755_v41 }
 0x231   : > { %778 = vrot.lane.b32.xlu2 %v752_v2, %s1350_s11  ;;  %v766_v59 = vsel %vm717_vm3, 0.0, %v765_v50  ;;  %v769_v52 = vrot.slane %v760_v21, 4  ;;  %v767_v54 = vrot.slane %v752_v2, 4  ;;  %v764_v55 = vperm.slane %v756_v51, %v747_v35 }
 0x232   : > { %774 = vrot.lane.b32.xlu1 %v766_v59, %s1351_s10 }
 0x233   : > { %v770_v53 = vsel %vm717_vm3, 0.0, %v769_v52  ;;  %v768_v56 = vsel %vm717_vm3, 0.0, %v767_v54  ;;  %v771_v60 = vrot.slane %v764_v55, 4 }
 0x234   : > { %790 = vrot.lane.b32.xlu0 %v770_v53, %s1352_s27  ;;  %s864_s27 = scalar_lea.hbm %s1777_s5, %s986_s14 }
 0x235   : > { %v772_v61 = vsel %vm717_vm3, 0.0, %v771_v60  ;;  %s868_s17 = sshll.u32 %s864_s27, 4  ;;  %s869_s17 = int_to_ptr.hbm [resolvable:$true] %s868_s17 }
 0x236   : > { %s1231_s25 = sshra.s32 %s869_s17, 4  ;;  %s1232_s25 = int_to_ptr.hbm [resolvable:$true] %s1231_s25 }
 0x237   : > { %s1233_s24 = scalar_lea.hbm %s1232_s25, 8  ;;  %p1238_p11 = scmp.lt.s32.totalorder %s1232_s25, %s1777_s5 }
 0x238   : > { %p1234_p7 = scmp.ne.s32.totalorder %s1232_s25, %s1233_s24  ;;  %p1239_p13 = scmp.lt.s32.totalorder %s1237_s6, %s1233_s24 }
 0x239   : > { %786 = vrot.lane.b32.xlu2 %v760_v21, %s1353_s16  ;;  %s1793_s16 = scalar_lea.vmem [#allocation6], %s1503_s9 }
 0x23a   : > { %782 = vrot.lane.b32.xlu1 %v768_v56, %s1354_s13  ;;  %s866_s29 = sshll.u32 %s1793_s16, 4  ;;  %s1794_s13 = smov %s1793_s16  ;;  %s867_s29 = int_to_ptr.vmem [resolvable:$true] %s866_s29 }
 0x23b   : > { %p1235_p9 = pnand %p1234_p7, %p1469_p12  ;;  %p1240_p0 = por %p1239_p13, %p1238_p11 }
 0x23c   : > { %819 = vperm.xlu0 %1182, %v816_v57  }
 0x23d   : > { %p1236_p10 = pneg %p1235_p9 }
 0x23f   : > { %p1241_p1 = pnand %p1240_p0, %p1236_p10 }
 0x241   : > { %798 = vrot.lane.b32.xlu2 %v772_v61, %s1355_s8  ;;  %s1795_s8 = sand.u32 1, %s1303_s19  }
 0x242   : > { %794 = vrot.lane.b32.xlu1 %v764_v55, %s1356_s12  ;;  %s852_s12 = scalar_lea.sflag [#allocation5], %s1795_s8 }
 0x28b   : > { %v779_v11 = vpop.permute.xlu2 %778 }
 0x293   : > { %v787_v17 = vpop.permute.xlu2 %786 }
 0x29b   : > { %v799_v6 = vpop.permute.xlu2 %798 }
 0x2a4   : > { %v775_v62 = vpop.permute.xlu1 %774 }
 0x2a5   : > { %v802_v49 = vsel %vm801_vm4, %v748_v45, %v775_v62 }
 0x2a6   : > { %v804_v0 = vsel %vm803_vm5, %v802_v49, %v779_v11  ;;  %v791_v4 = vpop.permute.xlu0 %790 }
 0x2ac   : > { %v783_v63 = vpop.permute.xlu1 %782 }
 0x2ad   : > { %v806_v1 = vsel %vm805_vm6, %v804_v0, %v783_v63 }
 0x2ae   : > { %v808_v3 = vsel %vm807_vm7, %v806_v1, %v787_v17  ;;  %v820_v10 = vpop.permute.xlu0 %819 }
 0x2af   : > { %v810_v5 = vsel %vm809_vm8, %v808_v3, %v791_v4 }
 0x2b4   : > { %v795_v46 = vpop.permute.xlu1 %794 }
 0x2b5   : > { %v812_v7 = vsel %vm811_vm9, %v810_v5, %v795_v46 }
 0x2b6   : > { %v814_v9 = vsel %vm813_vm10, %v812_v7, %v799_v6 }
 0x2b7   : > { %982 = vmatpush.msk.msra.mxu0 %vm826_vm11, %v814_v9 }
 0x2b8   : > { %983 = vmatmul.msk.f32.vlgmr.msra.gmra.mxu0 %vm822_vm12, %v815_v8 }
 0x335   : > { %v847_v44 = vpop.f32.mrf.mxu0 }
 0x336   : > { %v848_v12 = vadd.f32 %v847_v44, %v820_v10 }
 0x338   : > { %850 = vst [vmem:[%s1794_s13] sm:$0xff] %v848_v12 }
 0x339   : > { %1244 = shalt.err (!%p1241_p1)
}
 0x33a   : > { %1064 = dma.vmem_to_hbm [thread:$0]  (%p1469_p12), %s867_s29, 128, %s869_s17, %s852_s12  }
 0x33b PF: > { %p1075_p4 = scmp.ge.s32.totalorder %s1339_s28, 2  ;;  %s880_s9 = sand.u32 1, %s1299_s18  }
 0x33c   : > { %s881_s11 = scalar_lea.sflag [#allocation5], %s880_s9 }
 0x33d   : > { %p1071_p5 = pnand %p1075_p4, %p1482_p2 }
 0x33f   : > { %p1072_p6 = pneg %p1071_p5 }
 0x341   : > { %1294 = dma.done.wait (%p1072_p6), %s881_s11, 128  }
 0x342   : > { %1296 = vsyncadd (%p1072_p6), %s881_s11, 4294967168  ;;  %s21_s28 = sadd.s32 1, %s1339_s28   ;;  %s1796_s10 = sld [smem:[#allocation14_spill]] }
 0x343   : > { %p18_p8 = scmp.ge.s32.totalorder %s21_s28, 6   ;;  %s1797_s15 = sld [smem:[#allocation13_spill]] }
 0x344   : > { %s1798_s24 = sld [smem:[#allocation9_spill]]  ;;  %s1802_s18 = smov %s1303_s19 }
 0x345   : > { %s1799_s25 = sld [smem:[#allocation10_spill]]  ;;  %s1803_s19 = smov %s1307_s20 }
 0x346   : > { %s1800_s26 = sld [smem:[#allocation11_spill]]  ;;  %s1805_s21 = smov %s1315_s22 }
 0x347   : > { %s1801_s27 = sld [smem:[#allocation12_spill]]  ;;  %s1806_s22 = smov %s1319_s23 }
 0x348   : > { %s1804_s20 = smov %s1796_s10  ;;  %20 = sbr.rel (!%p18_p8) target bundleno = 9 (0x9), region = 92 }
 0x349   : > { %s1807_s23 = smov %s1797_s15 }
 0x34d   :  { %887 = vsyncpa [#allocation4], 1 }
 0x34e   :  { %889 = vsyncpa [#allocation4 + $0x1], 1 }
 0x34f   :  { %890 = vsyncpa [#allocation5], 1 }
 0x350   :  { %892 = vsyncpa [#allocation5 + $0x1], 1 }

</bundles_post_ra>
